<compile_context>
chip_gen: v6e
topology: v6e:2x2x1
jax: 0.10.0
libtpu: 0.0.40
codegen_flags: <defaults>
</compile_context>

<pallas_src>
from typing import NamedTuple

import jax
import jax.numpy as jnp
from jax.experimental import pallas as pl
from jax.experimental.pallas import tpu as pltpu


def _round_up(x, n):
    return (x + n - 1) // n * n


# --------------------------- hardware-aware policy ---------------------------

def _vmem_capacity_bytes():
    """Physical VMEM per TensorCore; conservative 64 MiB fallback (v7x)."""
    try:
        info = pltpu.get_tpu_info()
        for attr in ("vmem_capacity_bytes", "vmem_bytes", "vmem_size_bytes"):
            v = getattr(info, attr, None)
            if v:
                return int(v)
    except Exception:
        pass
    return 64 * 1024 * 1024


def _tile_policy(itemsize):
    """Returns (vmem_limit_bytes, tile_budget_bytes, tm_target, th_target)."""
    cap = _vmem_capacity_bytes()
    if cap >= 96 * 1024 * 1024:            # v5e / v6e: 128 MiB physical VMEM
        vmem_limit = 96 * 1024 * 1024
        tm_target, th_target = 640, 1024
    else:                                  # v7x: 64 MiB physical VMEM
        vmem_limit = 44 * 1024 * 1024
        tm_target, th_target = 512, 256
    if itemsize >= 4:                      # f32 path doubles every streamed buffer
        th_target = max(256, th_target // 2)
    budget = int(vmem_limit * 0.80)        # headroom for Mosaic internal scratch
    return vmem_limit, budget, tm_target, th_target


def _vmem_footprint(tm, th, n_h, d_pad, itemsize):
    """Estimated VMEM working set for one (row-block, hidden-chunk) step."""
    xb = 2 * tm * d_pad * itemsize              # x rows, double-buffered
    ob = 2 * tm * d_pad * itemsize              # output rows, double-buffered
    acc = (tm * d_pad * 4) if n_h > 1 else 0    # f32 accumulator scratch
    w13 = 2 * d_pad * (2 * th) * itemsize       # fused [w1|w3] chunk, double-buffered
    w2 = 2 * th * d_pad * itemsize              # w2 chunk, double-buffered
    tmp = tm * (3 * th) * 4                     # f32 h13 + gated temporaries
    return xb + ob + acc + w13 + w2 + tmp


def _choose_tm(m, tm_target):
    """Row tile: large enough to feed the MXU, waste-minimizing for ragged M."""
    m16 = _round_up(m, 16)
    if m16 <= tm_target:
        return m16
    best_tm = tm_target
    best_waste = _round_up(m, tm_target) - m
    t = tm_target - 16
    while t >= max(128, tm_target // 2):
        waste = _round_up(m, t) - m
        if waste < best_waste:
            best_tm, best_waste = t, waste
        t -= 16
    return best_tm


# --------------------------- weight packing (hoisted) ------------------------

class PackedFFN(NamedTuple):
    w13: jax.Array   # (d_pad, 2*h_pad): per hidden chunk j, cols = [w1_j | w3_j]
    w2t: jax.Array   # (h_pad, d_pad)
    dim: int
    hidden: int
    d_pad: int
    h_pad: int
    th: int


def pack_ffn_weights(w1, w2, w3, *, dtype):
    """Pad / transpose / interleave the FFN weights once (not per forward)."""
    h, d = w1.shape
    itemsize = jnp.dtype(dtype).itemsize
    _, budget, tm_target, th_target = _tile_policy(itemsize)

    d_pad = _round_up(d, 128)
    h128 = _round_up(h, 128)

    # Prefer full weight residency: hidden dim in a single chunk -> weights are
    # DMA'd once for the whole kernel instead of once per row block.
    if _vmem_footprint(tm_target, h128, 1, d_pad, itemsize) <= budget:
        th = h128
    else:
        th = min(th_target, h128)
        while th > 256 and _vmem_footprint(tm_target, th, 2, d_pad, itemsize) > budget:
            th = _round_up(th // 2, 128)
    h_pad = _round_up(h, th)
    n_h = h_pad // th

    def pad2(a, r, c):
        a = a.astype(dtype)
        return jnp.pad(a, ((0, r - a.shape[0]), (0, c - a.shape[1])))

    w1_t = pad2(w1.T, d_pad, h_pad)              # (Dp, Hp)
    w3_t = pad2(w3.T, d_pad, h_pad)              # (Dp, Hp)
    w2_t = pad2(w2.T, h_pad, d_pad)              # (Hp, Dp)
    # Interleave per hidden chunk so one BlockSpec block carries both operands
    # of the fused first matmul: columns [w1 chunk j | w3 chunk j].
    w13 = jnp.stack(
        [w1_t.reshape(d_pad, n_h, th), w3_t.reshape(d_pad, n_h, th)], axis=2
    ).reshape(d_pad, 2 * h_pad)
    return PackedFFN(w13, w2_t, d, h, d_pad, h_pad, th)


# --------------------------------- kernels -----------------------------------

def _ffn_kernel_resident(x_ref, w13_ref, w2_ref, o_ref):
    """Weights VMEM-resident: one row block per grid step, no accumulator."""
    hp = w2_ref.shape[0]
    x = x_ref[...]
    h13 = jnp.dot(x, w13_ref[...], preferred_element_type=jnp.float32)
    h1 = h13[:, :hp]                      # static, lane-aligned slices
    h3 = h13[:, hp:]
    g = (h1 * jax.nn.sigmoid(h1)) * h3    # silu(w1 x) * (w3 x), f32 on VPU/EUP
    o_ref[...] = jnp.dot(g.astype(w2_ref.dtype), w2_ref[...],
                         preferred_element_type=jnp.float32).astype(o_ref.dtype)


def _ffn_kernel_chunked(x_ref, w13_ref, w2_ref, o_ref, acc_ref):
    """Hidden dim streamed in chunks; f32 accumulator over chunks."""
    hj = pl.program_id(1)
    th = w2_ref.shape[0]
    x = x_ref[...]
    h13 = jnp.dot(x, w13_ref[...], preferred_element_type=jnp.float32)
    h1 = h13[:, :th]
    h3 = h13[:, th:]
    g = (h1 * jax.nn.sigmoid(h1)) * h3
    partial = jnp.dot(g.astype(w2_ref.dtype), w2_ref[...],
                      preferred_element_type=jnp.float32)

    @pl.when(hj == 0)
    def _():
        acc_ref[...] = partial            # no separate zero-fill pass

    @pl.when(hj > 0)
    def _():
        acc_ref[...] += partial

    @pl.when(hj == pl.num_programs(1) - 1)
    def _():
        o_ref[...] = acc_ref[...].astype(o_ref.dtype)


# --------------------------------- wrapper -----------------------------------

def feed_forward_pallas(x, packed: PackedFFN, *, block_rows=None):
    """SwiGLU FFN forward: w2( silu(w1 x) * w3 x ) with pre-packed weights."""
    b, s, d = x.shape
    assert d == packed.dim, "x feature dim does not match packed weights"
    m = b * s
    cdt = x.dtype
    itemsize = jnp.dtype(cdt).itemsize

    vmem_limit, budget, tm_target, _ = _tile_policy(itemsize)
    d_pad, h_pad, th = packed.d_pad, packed.h_pad, packed.th
    n_h = h_pad // th

    if block_rows is not None:
        tm_target = _round_up(block_rows, 16)
    tm = _choose_tm(m, tm_target)
    while tm > 128 and _vmem_footprint(tm, th, n_h, d_pad, itemsize) > budget:
        tm = max(128, _round_up(tm // 2, 16))
    m_pad = _round_up(m, tm)
    n_rows = m_pad // tm

    x2d = jnp.pad(x.reshape(m, d).astype(cdt),
                  ((0, m_pad - m), (0, d_pad - d)))

    # Cost estimate: weights are re-streamed per row block unless resident.
    flops = 2 * m_pad * d_pad * (2 * h_pad) + 2 * m_pad * h_pad * d_pad
    weight_bytes = (packed.w13.size + packed.w2t.size) * itemsize
    weight_stream_factor = 1 if n_h == 1 else n_rows
    bytes_accessed = (x2d.size * itemsize + m_pad * d_pad * itemsize
                      + weight_bytes * weight_stream_factor)
    cost = pl.CostEstimate(flops=flops, transcendentals=m_pad * h_pad,
                           bytes_accessed=bytes_accessed)

    if n_h == 1:
        out2d = pl.pallas_call(
            _ffn_kernel_resident,
            out_shape=jax.ShapeDtypeStruct((m_pad, d_pad), cdt),
            grid_spec=pltpu.PrefetchScalarGridSpec(
                num_scalar_prefetch=0,
                grid=(n_rows,),
                in_specs=[
                    pl.BlockSpec((tm, d_pad), lambda i: (i, 0)),          # x rows
                    pl.BlockSpec((d_pad, 2 * h_pad), lambda i: (0, 0)),   # [w1|w3]
                    pl.BlockSpec((h_pad, d_pad), lambda i: (0, 0)),       # w2^T
                ],
                out_specs=pl.BlockSpec((tm, d_pad), lambda i: (i, 0)),
            ),
            compiler_params=pltpu.CompilerParams(
                dimension_semantics=("parallel",),
                vmem_limit_bytes=vmem_limit,
            ),
            cost_estimate=cost,
        )(x2d, packed.w13, packed.w2t)
    else:
        out2d = pl.pallas_call(
            _ffn_kernel_chunked,
            out_shape=jax.ShapeDtypeStruct((m_pad, d_pad), cdt),
            grid_spec=pltpu.PrefetchScalarGridSpec(
                num_scalar_prefetch=0,
                grid=(n_rows, n_h),
                in_specs=[
                    pl.BlockSpec((tm, d_pad), lambda i, j: (i, 0)),       # x rows
                    pl.BlockSpec((d_pad, 2 * th), lambda i, j: (0, j)),   # [w1|w3]_j
                    pl.BlockSpec((th, d_pad), lambda i, j: (j, 0)),       # w2^T_j
                ],
                out_specs=pl.BlockSpec((tm, d_pad), lambda i, j: (i, 0)),
                scratch_shapes=[pltpu.VMEM((tm, d_pad), jnp.float32)],
            ),
            compiler_params=pltpu.CompilerParams(
                dimension_semantics=("parallel", "arbitrary"),
                vmem_limit_bytes=vmem_limit,
            ),
            cost_estimate=cost,
        )(x2d, packed.w13, packed.w2t)

    return out2d[:m, :d].reshape(b, s, d)


def feed_forward_pallas_raw(x, w1, w2, w3):
    """Convenience path (packs weights every call; prefer pack_ffn_weights)."""
    return feed_forward_pallas(x, pack_ffn_weights(w1, w2, w3, dtype=x.dtype))


# ------------------------------- test harness --------------------------------

def make_params(key, dim, multiple_of=12, ffn_dim_multiplier=None, dtype=jnp.float32):
    # Mirrors FeedForward.__init__ hidden-dim computation.
    hidden_dim = int(2 * 4 * dim / 3)
    if ffn_dim_multiplier is not None:
        hidden_dim = int(ffn_dim_multiplier * hidden_dim)
    hidden_dim = multiple_of * ((hidden_dim + multiple_of - 1) // multiple_of)

    k1, k2, k3 = jax.random.split(key, 3)
    b1 = 1.0 / (dim ** 0.5)
    b2 = 1.0 / (hidden_dim ** 0.5)
    w1 = jax.random.uniform(k1, (hidden_dim, dim), dtype, minval=-b1, maxval=b1)
    w2 = jax.random.uniform(k2, (dim, hidden_dim), dtype, minval=-b2, maxval=b2)
    w3 = jax.random.uniform(k3, (hidden_dim, dim), dtype, minval=-b1, maxval=b1)
    return w1, w2, w3, hidden_dim


def _ref_forward(x, w1, w2, w3):
    # Pure-JAX reference of the PyTorch forward.
    h1 = x @ w1.T
    h3 = x @ w3.T
    return (jax.nn.silu(h1) * h3) @ w2.T


if __name__ == "__main__":
    key = jax.random.PRNGKey(0)
    kx, kp = jax.random.split(key)

    batch, seq, dim = 2, 8, 64  # small shapes consistent with the module
    w1, w2, w3, hidden_dim = make_params(kp, dim, multiple_of=12)
    x = jax.random.normal(kx, (batch, seq, dim), jnp.float32)

    # --- f32 path (matches the PyTorch module numerics) ---------------------
    packed_f32 = pack_ffn_weights(w1, w2, w3, dtype=jnp.float32)  # hoisted, once
    out_f32 = jax.block_until_ready(feed_forward_pallas(x, packed_f32))
    ref_f32 = _ref_forward(x, w1, w2, w3)
    assert out_f32.shape == (batch, seq, dim)
    assert jnp.allclose(out_f32, ref_f32, atol=2e-4, rtol=2e-4), "f32 mismatch"

    # --- bf16 fast path (bf16 MXU operands, f32 accumulation) ---------------
    x_bf = x.astype(jnp.bfloat16)
    packed_bf = pack_ffn_weights(w1, w2, w3, dtype=jnp.bfloat16)
    out_bf = jax.block_until_ready(feed_forward_pallas(x_bf, packed_bf))
    ref_bf = _ref_forward(
        x_bf.astype(jnp.float32),
        w1.astype(jnp.bfloat16).astype(jnp.float32),
        w2.astype(jnp.bfloat16).astype(jnp.float32),
        w3.astype(jnp.bfloat16).astype(jnp.float32),
    )
    assert out_bf.shape == (batch, seq, dim)
    assert jnp.allclose(out_bf.astype(jnp.float32), ref_bf, atol=6e-2, rtol=6e-2), \
        "bf16 mismatch"

    print("KERNEL_OK")
</pallas_src>

<mosaic_0001>
module attributes {stable_mosaic.version = 11 : i64} {
  func.func @_ffn_kernel_resident(%arg0: i32, %arg1: memref<16x128xf32, #tpu.memory_space<vmem>>, %arg2: memref<128x512xf32, #tpu.memory_space<vmem>>, %arg3: memref<256x128xf32, #tpu.memory_space<vmem>>, %arg4: memref<16x128xf32, #tpu.memory_space<vmem>>) attributes {dimension_semantics = [#tpu.dimension_semantics<parallel>], iteration_bounds = array<i64: 1>, scalar_prefetch = 0 : i64, scratch_operands = 0 : i64, tpu.core_type = #tpu.core_type<tc>, window_params = [{transform_indices = @transform_0, window_bounds = array<i64: 16, 128>}, {pipeline_mode = #tpu.pipeline_mode<synchronous>, transform_indices = @transform_1, window_bounds = array<i64: 128, 512>}, {pipeline_mode = #tpu.pipeline_mode<synchronous>, transform_indices = @transform_2, window_bounds = array<i64: 256, 128>}, {transform_indices = @transform_3, window_bounds = array<i64: 16, 128>}]} {
    %c0 = arith.constant 0 : index
    %c0_0 = arith.constant 0 : index
    %0 = vector.load %arg1[%c0, %c0_0] : memref<16x128xf32, #tpu.memory_space<vmem>>, vector<16x128xf32>
    %c0_1 = arith.constant 0 : index
    %c0_2 = arith.constant 0 : index
    %1 = vector.load %arg2[%c0_1, %c0_2] : memref<128x512xf32, #tpu.memory_space<vmem>>, vector<128x512xf32>
    %cst = arith.constant dense<0.000000e+00> : vector<16x512xf32>
    %2 = tpu.matmul %0, %1, %cst {dimension_numbers = #tpu.dot_dimension_numbers<[1], [0], [0], [1], [0, 0, 1, 1], [], []>} : vector<16x128xf32>, vector<128x512xf32>, vector<16x512xf32> -> vector<16x512xf32>
    %3 = vector.extract_strided_slice %2 {offsets = [0, 0], sizes = [16, 256], strides = [1, 1]} : vector<16x512xf32> to vector<16x256xf32>
    %4 = vector.extract_strided_slice %2 {offsets = [0, 256], sizes = [16, 256], strides = [1, 1]} : vector<16x512xf32> to vector<16x256xf32>
    %5 = arith.negf %3 : vector<16x256xf32>
    %6 = math.exp %5 : vector<16x256xf32>
    %cst_3 = arith.constant 1.000000e+00 : f32
    %7 = vector.broadcast %cst_3 : f32 to vector<16x256xf32>
    %8 = arith.addf %7, %6 : vector<16x256xf32>
    %9 = arith.divf %7, %8 : vector<16x256xf32>
    %10 = arith.mulf %3, %9 : vector<16x256xf32>
    %11 = arith.mulf %10, %4 : vector<16x256xf32>
    %c0_4 = arith.constant 0 : index
    %c0_5 = arith.constant 0 : index
    %12 = vector.load %arg3[%c0_4, %c0_5] : memref<256x128xf32, #tpu.memory_space<vmem>>, vector<256x128xf32>
    %cst_6 = arith.constant dense<0.000000e+00> : vector<16x128xf32>
    %13 = tpu.matmul %11, %12, %cst_6 {dimension_numbers = #tpu.dot_dimension_numbers<[1], [0], [0], [1], [0, 0, 1, 1], [], []>} : vector<16x256xf32>, vector<256x128xf32>, vector<16x128xf32> -> vector<16x128xf32>
    %c0_7 = arith.constant 0 : index
    %c0_8 = arith.constant 0 : index
    %14 = vector.load %arg4[%c0_7, %c0_8] : memref<16x128xf32, #tpu.memory_space<vmem>>, vector<16x128xf32>
    tpu.vector_store %arg4[%c0_7, %c0_8], %13 {strides = array<i32>} : memref<16x128xf32, #tpu.memory_space<vmem>>, vector<16x128xf32>,
    return
  }
  func.func @transform_0(%arg0: i32) -> (i32, i32) {
    %c0_i32 = arith.constant 0 : i32
    %c0_i32_0 = arith.constant 0 : i32
    return %arg0, %c0_i32 : i32, i32
  }
  func.func @transform_1(%arg0: i32) -> (i32, i32) {
    %c0_i32 = arith.constant 0 : i32
    %c0_i32_0 = arith.constant 0 : i32
    %c0_i32_1 = arith.constant 0 : i32
    return %c0_i32, %c0_i32_0 : i32, i32
  }
  func.func @transform_2(%arg0: i32) -> (i32, i32) {
    %c0_i32 = arith.constant 0 : i32
    %c0_i32_0 = arith.constant 0 : i32
    %c0_i32_1 = arith.constant 0 : i32
    return %c0_i32, %c0_i32_0 : i32, i32
  }
  func.func @transform_3(%arg0: i32) -> (i32, i32) {
    %c0_i32 = arith.constant 0 : i32
    %c0_i32_0 = arith.constant 0 : i32
    return %arg0, %c0_i32 : i32, i32
  }
}

</mosaic_0001>

<bundles_post_ra>
// kernel: tpu_custom_call.1
= control target key start
LH: loop header
LB: loop body
LE: loop exit
PB: predicated region body
PF: predicated region fallthrough
CT: control target
= control target key end

     0   :  { %8 = vsyncpa [#allocation3], 0  ;;  %s674_s0 = inlined_call_operand.hbm [shape: f32[16,128], index: 0, kind: input, shape index: {}]   ;;  %s675_s1 = inlined_call_operand.hbm [shape: f32[128,512], index: 1, kind: input, shape index: {}]   ;;  %s676_s2 = inlined_call_operand.hbm [shape: f32[256,128], index: 2, kind: input, shape index: {}]   ;;  %s677_s3 = inlined_call_operand.hbm [shape: f32[16,128], index: 3, kind: output, shape index: {}]  }
   0x1   :  { %9 = vsyncpa [#allocation6], 0 }
   0x2   :  { %10 = vsyncpa [#allocation4], 0  ;;  %s620_s12 = smov [#allocation5]  }
   0x3   :  { %s28_s13 = sshll.u32 %s620_s12, 4  ;;  %s29_s13 = int_to_ptr.vmem [resolvable:$true] %s28_s13 }
   0x4   :  { %s542_s14 = scalar_lea.vmem %s29_s13, 8192  ;;  %p547_p1 = scmp.lt.s32.totalorder %s29_s13, %s29_s13 }
   0x5   :  { %p543_p0 = scmp.ne.s32.totalorder %s29_s13, %s542_s14  ;;  %p548_p2 = scmp.lt.s32.totalorder %s542_s14, %s542_s14 }
   0x7   :  { %p549_p3 = por %p548_p2, %p547_p1 }
   0x9   :  { %p550_p4 = pnand %p549_p3, %p543_p0 }
   0xb   :  { %553 = shalt.err (!%p550_p4)
}
   0xc   :  { %s621_s15 = smov 512   ;;  %s622_s16 = smov 32  }
   0xd   :  { %34 = dma.hbm_to_vmem [thread:$0]  %s675_s1, 8192, %s29_s13, [#allocation6], %s621_s15, %s621_s15, %s622_s16  }
   0xe   :  { %s623_s19 = smov [#allocation2]  }
   0xf   :  { %s16_s20 = sshll.u32 %s623_s19, 4  ;;  %s17_s20 = int_to_ptr.vmem [resolvable:$true] %s16_s20 }
  0x10   :  { %s562_s21 = scalar_lea.vmem %s17_s20, 256  ;;  %p567_p6 = scmp.lt.s32.totalorder %s17_s20, %s17_s20 }
  0x11   :  { %p563_p5 = scmp.ne.s32.totalorder %s17_s20, %s562_s21  ;;  %p568_p7 = scmp.lt.s32.totalorder %s562_s21, %s562_s21 }
  0x13   :  { %p569_p8 = por %p568_p7, %p567_p6 }
  0x15   :  { %p570_p9 = pnand %p569_p8, %p563_p5 }
  0x17   :  { %573 = shalt.err (!%p570_p9)
}
  0x18   :  { %s624_s22 = smov 128   ;;  %s625_s23 = smov 8  }
  0x19   :  { %22 = dma.hbm_to_vmem [thread:$0]  %s674_s0, 256, %s17_s20, [#allocation3], %s624_s22, %s624_s22, %s625_s23  }
  0x1a   :  { %s626_s1 = smov [#allocation7]  }
  0x1b   :  { %s40_s26 = sshll.u32 %s626_s1, 4  ;;  %s41_s26 = int_to_ptr.vmem [resolvable:$true] %s40_s26 }
  0x1c   :  { %s582_s27 = scalar_lea.vmem %s41_s26, 4096  ;;  %p587_p11 = scmp.lt.s32.totalorder %s41_s26, %s41_s26 }
  0x1d   :  { %p583_p10 = scmp.ne.s32.totalorder %s41_s26, %s582_s27  ;;  %p588_p12 = scmp.lt.s32.totalorder %s582_s27, %s582_s27 }
  0x1f   :  { %p589_p13 = por %p588_p12, %p587_p11 }
  0x21   :  { %p590_p0 = pnand %p589_p13, %p583_p10 }
  0x23   :  { %593 = shalt.err (!%p590_p0)
}
  0x24   :  { %46 = dma.hbm_to_vmem [thread:$0]  %s676_s2, 4096, %s41_s26, [#allocation6], %s624_s22, %s624_s22, %s625_s23  }
  0x25   :  { %614 = dma.done.wait [#allocation3], 256  }
  0x26   :  { %615 = vsyncadd [#allocation3], 4294967040 }
  0x27   :  { %616 = dma.done.wait [#allocation6], 12288  }
  0x28   :  { %617 = vsyncadd [#allocation6], 4294955008  ;;  %v627_v0 = vmov 0.0   ;;  %v119_v1 = vld [vmem:[#allocation5 + $0x1e8] sm:$0xff]  ;;  %v118_v2 = vld [vmem:[#allocation5 + $0x1e0] sm:$0xff]  ;;  %s628_s0 = smov [#allocation8]  }
  0x29   :  { %186 = vmatprep.mubr.f32.mxu0 %v627_v0  ;;  %263 = vmatprep.mubr.f32.mxu1 %v627_v0  ;;  %v115_v3 = vld [vmem:[#allocation5 + $0x1c8] sm:$0xff]  ;;  %v114_v4 = vld [vmem:[#allocation5 + $0x1c0] sm:$0xff]  ;;  %v121_v15 = vld [vmem:[#allocation5 + $0x1f8] sm:$0xff]  ;;  %s422_s2 = sshll.u32 %s628_s0, 4  ;;  %s423_s2 = int_to_ptr.vmem [resolvable:$true] %s422_s2 }
  0x2a   :  { %122 = vmatprep.subr.mxu0 %v119_v1  ;;  %v111_v5 = vld [vmem:[#allocation5 + $0x1a8] sm:$0xff]  ;;  %v110_v6 = vld [vmem:[#allocation5 + $0x1a0] sm:$0xff]  ;;  %v120_v16 = vld [vmem:[#allocation5 + $0x1f0] sm:$0xff]  ;;  %199 = vmatprep.subr.mxu1 %v121_v15  ;;  %s594_s30 = scalar_lea.vmem %s423_s2, 256  ;;  %p599_p2 = scmp.lt.s32.totalorder %s423_s2, %s423_s2 }
  0x2b   :  { %123 = vmatpush1.msra.mxu0 %v118_v2  ;;  %v107_v7 = vld [vmem:[#allocation5 + $0x188] sm:$0xff]  ;;  %v106_v8 = vld [vmem:[#allocation5 + $0x180] sm:$0xff]  ;;  %v117_v17 = vld [vmem:[#allocation5 + $0x1d8] sm:$0xff]  ;;  %200 = vmatpush1.msra.mxu1 %v120_v16  ;;  %p595_p1 = scmp.ne.s32.totalorder %s423_s2, %s594_s30  ;;  %p600_p3 = scmp.lt.s32.totalorder %s594_s30, %s594_s30 }
  0x2c   :  { %124 = vmatprep.subr.mxu0 %v115_v3  ;;  %v103_v9 = vld [vmem:[#allocation5 + $0x168] sm:$0xff]  ;;  %v102_v10 = vld [vmem:[#allocation5 + $0x160] sm:$0xff]  ;;  %v116_v19 = vld [vmem:[#allocation5 + $0x1d0] sm:$0xff]  ;;  %201 = vmatprep.subr.mxu1 %v117_v17 }
  0x2d   :  { %125 = vmatpush1.msra.mxu0 %v114_v4  ;;  %v99_v11 = vld [vmem:[#allocation5 + $0x148] sm:$0xff]  ;;  %v98_v12 = vld [vmem:[#allocation5 + $0x140] sm:$0xff]  ;;  %v113_v21 = vld [vmem:[#allocation5 + $0x1b8] sm:$0xff]  ;;  %202 = vmatpush1.msra.mxu1 %v116_v19  ;;  %p601_p4 = por %p600_p3, %p599_p2 }
  0x2e   :  { %126 = vmatprep.subr.mxu0 %v111_v5  ;;  %v95_v13 = vld [vmem:[#allocation5 + $0x128] sm:$0xff]  ;;  %v94_v14 = vld [vmem:[#allocation5 + $0x120] sm:$0xff]  ;;  %v112_v23 = vld [vmem:[#allocation5 + $0x1b0] sm:$0xff]  ;;  %203 = vmatprep.subr.mxu1 %v113_v21 }
  0x2f   :  { %127 = vmatpush1.msra.mxu0 %v110_v6  ;;  %v91_v18 = vld [vmem:[#allocation5 + $0x108] sm:$0xff]  ;;  %v90_v20 = vld [vmem:[#allocation5 + $0x100] sm:$0xff]  ;;  %v109_v25 = vld [vmem:[#allocation5 + $0x198] sm:$0xff]  ;;  %204 = vmatpush1.msra.mxu1 %v112_v23  ;;  %p602_p5 = pnand %p601_p4, %p595_p1 }
  0x30   :  { %128 = vmatprep.subr.mxu0 %v107_v7  ;;  %v87_v22 = vld [vmem:[#allocation5 + $0xe8] sm:$0xff]  ;;  %v86_v24 = vld [vmem:[#allocation5 + $0xe0] sm:$0xff]  ;;  %v108_v27 = vld [vmem:[#allocation5 + $0x190] sm:$0xff]  ;;  %205 = vmatprep.subr.mxu1 %v109_v25 }
  0x31   :  { %129 = vmatpush1.msra.mxu0 %v106_v8  ;;  %v83_v26 = vld [vmem:[#allocation5 + $0xc8] sm:$0xff]  ;;  %v82_v28 = vld [vmem:[#allocation5 + $0xc0] sm:$0xff]  ;;  %v105_v29 = vld [vmem:[#allocation5 + $0x178] sm:$0xff]  ;;  %206 = vmatpush1.msra.mxu1 %v108_v27 }
  0x32   :  { %130 = vmatprep.subr.mxu0 %v103_v9  ;;  %v79_v30 = vld [vmem:[#allocation5 + $0xa8] sm:$0xff]  ;;  %v104_v31 = vld [vmem:[#allocation5 + $0x170] sm:$0xff]  ;;  %v78_v32 = vld [vmem:[#allocation5 + $0xa0] sm:$0xff]  ;;  %207 = vmatprep.subr.mxu1 %v105_v29 }
  0x33   :  { %131 = vmatpush1.msra.mxu0 %v102_v10  ;;  %v101_v33 = vld [vmem:[#allocation5 + $0x158] sm:$0xff]  ;;  %v75_v34 = vld [vmem:[#allocation5 + $0x88] sm:$0xff]  ;;  %v100_v35 = vld [vmem:[#allocation5 + $0x150] sm:$0xff]  ;;  %208 = vmatpush1.msra.mxu1 %v104_v31 }
  0x34   :  { %132 = vmatprep.subr.mxu0 %v99_v11  ;;  %v74_v36 = vld [vmem:[#allocation5 + $0x80] sm:$0xff]  ;;  %v97_v37 = vld [vmem:[#allocation5 + $0x138] sm:$0xff]  ;;  %v71_v38 = vld [vmem:[#allocation5 + $0x68] sm:$0xff]  ;;  %209 = vmatprep.subr.mxu1 %v101_v33 }
  0x35   :  { %133 = vmatpush1.msra.mxu0 %v98_v12  ;;  %v96_v39 = vld [vmem:[#allocation5 + $0x130] sm:$0xff]  ;;  %v70_v40 = vld [vmem:[#allocation5 + $0x60] sm:$0xff]  ;;  %210 = vmatpush1.msra.mxu1 %v100_v35  ;;  %v93_v41 = vld [vmem:[#allocation5 + $0x118] sm:$0xff] }
  0x36   :  { %134 = vmatprep.subr.mxu0 %v95_v13  ;;  %v67_v42 = vld [vmem:[#allocation5 + $0x48] sm:$0xff]  ;;  %211 = vmatprep.subr.mxu1 %v97_v37  ;;  %v92_v43 = vld [vmem:[#allocation5 + $0x110] sm:$0xff]  ;;  %v66_v44 = vld [vmem:[#allocation5 + $0x40] sm:$0xff] }
  0x37   :  { %135 = vmatpush1.msra.mxu0 %v94_v14  ;;  %212 = vmatpush1.msra.mxu1 %v96_v39  ;;  %v89_v45 = vld [vmem:[#allocation5 + $0xf8] sm:$0xff]  ;;  %v63_v46 = vld [vmem:[#allocation5 + $0x28] sm:$0xff]  ;;  %v88_v47 = vld [vmem:[#allocation5 + $0xf0] sm:$0xff] }
  0x38   :  { %136 = vmatprep.subr.mxu0 %v91_v18  ;;  %213 = vmatprep.subr.mxu1 %v93_v41  ;;  %v62_v48 = vld [vmem:[#allocation5 + $0x20] sm:$0xff]  ;;  %v85_v49 = vld [vmem:[#allocation5 + $0xd8] sm:$0xff]  ;;  %v59_v50 = vld [vmem:[#allocation5 + $0x8] sm:$0xff] }
  0x39   :  { %137 = vmatpush1.msra.mxu0 %v90_v20  ;;  %214 = vmatpush1.msra.mxu1 %v92_v43  ;;  %v84_v51 = vld [vmem:[#allocation5 + $0xd0] sm:$0xff]  ;;  %v58_v52 = vld [vmem:[#allocation5] sm:$0xff]  ;;  %v81_v53 = vld [vmem:[#allocation5 + $0xb8] sm:$0xff] }
  0x3a   :  { %138 = vmatprep.subr.mxu0 %v87_v22  ;;  %215 = vmatprep.subr.mxu1 %v89_v45  ;;  %v56_v54 = vld [vmem:[#allocation2] sm:$0xff]  ;;  %v77_v56 = vld [vmem:[#allocation5 + $0x98] sm:$0xff]  ;;  %v337_v8 = vld [vmem:[#allocation7 + $0xe8] sm:$0xff] }
  0x3b   :  { %139 = vmatpush1.msra.mxu0 %v86_v24  ;;  %216 = vmatpush1.msra.mxu1 %v88_v47  ;;  %v80_v55 = vld [vmem:[#allocation5 + $0xb0] sm:$0xff]  ;;  %v73_v58 = vld [vmem:[#allocation5 + $0x78] sm:$0xff]  ;;  %v321_v9 = vld [vmem:[#allocation7 + $0x68] sm:$0xff] }
  0x3c   :  { %140 = vmatprep.subr.mxu0 %v83_v26  ;;  %217 = vmatprep.subr.mxu1 %v85_v49  ;;  %v76_v57 = vld [vmem:[#allocation5 + $0x90] sm:$0xff]  ;;  %v57_v59 = vld [vmem:[#allocation2 + $0x8] sm:$0xff]  ;;  %v336_v10 = vld [vmem:[#allocation7 + $0xe0] sm:$0xff] }
  0x3d   :  { %141 = vmatpush1.msra.mxu0 %v82_v28  ;;  %218 = vmatpush1.msra.mxu1 %v84_v51  ;;  %v72_v60 = vld [vmem:[#allocation5 + $0x70] sm:$0xff]  ;;  %v69_v61 = vld [vmem:[#allocation5 + $0x58] sm:$0xff]  ;;  %v333_v15 = vld [vmem:[#allocation7 + $0xc8] sm:$0xff] }
  0x3e   :  { %142 = vmatprep.subr.mxu0 %v79_v30  ;;  %219 = vmatprep.subr.mxu1 %v81_v53  ;;  %v68_v62 = vld [vmem:[#allocation5 + $0x50] sm:$0xff]  ;;  %v65_v63 = vld [vmem:[#allocation5 + $0x38] sm:$0xff]  ;;  %v317_v16 = vld [vmem:[#allocation7 + $0x48] sm:$0xff] }
  0x3f   :  { %143 = vmatpush1.msra.mxu0 %v78_v32  ;;  %220 = vmatpush1.msra.mxu1 %v80_v55  ;;  %v64_v1 = vld [vmem:[#allocation5 + $0x30] sm:$0xff]  ;;  %v61_v2 = vld [vmem:[#allocation5 + $0x18] sm:$0xff]  ;;  %v332_v17 = vld [vmem:[#allocation7 + $0xc0] sm:$0xff] }
  0x40   :  { %144 = vmatprep.subr.mxu0 %v75_v34  ;;  %221 = vmatprep.subr.mxu1 %v77_v56  ;;  %v60_v3 = vld [vmem:[#allocation5 + $0x10] sm:$0xff]  ;;  %v339_v4 = vld [vmem:[#allocation7 + $0xf8] sm:$0xff]  ;;  %v316_v18 = vld [vmem:[#allocation7 + $0x40] sm:$0xff] }
  0x41   :  { %145 = vmatpush1.msra.mxu0 %v74_v36  ;;  %222 = vmatpush1.msra.mxu1 %v76_v57  ;;  %v323_v5 = vld [vmem:[#allocation7 + $0x78] sm:$0xff]  ;;  %v338_v6 = vld [vmem:[#allocation7 + $0xf0] sm:$0xff]  ;;  %v329_v23 = vld [vmem:[#allocation7 + $0xa8] sm:$0xff] }
  0x42   :  { %146 = vmatprep.subr.mxu0 %v71_v38  ;;  %223 = vmatprep.subr.mxu1 %v73_v58  ;;  %v322_v7 = vld [vmem:[#allocation7 + $0x70] sm:$0xff]  ;;  %v335_v11 = vld [vmem:[#allocation7 + $0xd8] sm:$0xff]  ;;  %v313_v24 = vld [vmem:[#allocation7 + $0x28] sm:$0xff] }
  0x43   :  { %147 = vmatpush1.msra.mxu0 %v70_v40  ;;  %224 = vmatpush1.msra.mxu1 %v72_v60  ;;  %v319_v12 = vld [vmem:[#allocation7 + $0x58] sm:$0xff]  ;;  %v334_v13 = vld [vmem:[#allocation7 + $0xd0] sm:$0xff]  ;;  %v328_v25 = vld [vmem:[#allocation7 + $0xa0] sm:$0xff] }
  0x44   :  { %148 = vmatprep.subr.mxu0 %v67_v42  ;;  %225 = vmatprep.subr.mxu1 %v69_v61  ;;  %v318_v14 = vld [vmem:[#allocation7 + $0x50] sm:$0xff]  ;;  %v331_v19 = vld [vmem:[#allocation7 + $0xb8] sm:$0xff]  ;;  %v312_v26 = vld [vmem:[#allocation7 + $0x20] sm:$0xff] }
  0x45   :  { %149 = vmatpush1.msra.mxu0 %v66_v44  ;;  %226 = vmatpush1.msra.mxu1 %v68_v62  ;;  %v315_v20 = vld [vmem:[#allocation7 + $0x38] sm:$0xff]  ;;  %v330_v21 = vld [vmem:[#allocation7 + $0xb0] sm:$0xff]  ;;  %v325_v31 = vld [vmem:[#allocation7 + $0x88] sm:$0xff] }
  0x46   :  { %150 = vmatprep.subr.mxu0 %v63_v46  ;;  %227 = vmatprep.subr.mxu1 %v65_v63  ;;  %v314_v22 = vld [vmem:[#allocation7 + $0x30] sm:$0xff]  ;;  %v327_v27 = vld [vmem:[#allocation7 + $0x98] sm:$0xff]  ;;  %v309_v32 = vld [vmem:[#allocation7 + $0x8] sm:$0xff] }
  0x47   :  { %151 = vmatpush1.msra.mxu0 %v62_v48  ;;  %228 = vmatpush1.msra.mxu1 %v64_v1  ;;  %v311_v28 = vld [vmem:[#allocation7 + $0x18] sm:$0xff]  ;;  %v326_v29 = vld [vmem:[#allocation7 + $0x90] sm:$0xff]  ;;  %v324_v33 = vld [vmem:[#allocation7 + $0x80] sm:$0xff] }
  0x48   :  { %152 = vmatprep.subr.mxu0 %v59_v50  ;;  %229 = vmatprep.subr.mxu1 %v61_v2  ;;  %v310_v30 = vld [vmem:[#allocation7 + $0x10] sm:$0xff]  ;;  %v308_v34 = vld [vmem:[#allocation7] sm:$0xff] }
  0x49   :  { %153 = vmatpush1.msra.mxu0 %v58_v52  ;;  %230 = vmatpush1.msra.mxu1 %v60_v3 }
  0x4a   :  { %187 = vmatmul.mubr.f32.vlgmr.msra.gmra.mxu0 %v56_v54  ;;  %264 = vmatmul.mubr.f32.vlgmr.msra.gmra.mxu1 %v56_v54 }
  0x4b   :  { %192 = vmatprep.mubr.f32.mxu0 %v627_v0  ;;  %269 = vmatprep.mubr.f32.mxu1 %v627_v0  ;;  %v320_v0 = vld [vmem:[#allocation7 + $0x60] sm:$0xff] }
  0x4c   :  { %439 = vmatprep.subr.mxu0 %v339_v4  ;;  %477 = vmatprep.subr.mxu1 %v339_v4 }
  0x4d   :  { %440 = vmatpush3.msra.mxu0 %v323_v5  ;;  %493 = vmatpush3.msra.mxu1 %v323_v5 }
  0x4e   :  { %193 = vmatmul.mubr.f32.gmra.mxu0 %v57_v59  ;;  %270 = vmatmul.mubr.f32.gmra.mxu1 %v57_v59 }
  0x4f   :  { %441 = vmatprep.subr.mxu0 %v338_v6  ;;  %478 = vmatprep.subr.mxu1 %v338_v6 }
  0x50   :  { %442 = vmatpush3.msra.mxu0 %v322_v7  ;;  %494 = vmatpush3.msra.mxu1 %v322_v7 }
  0x51   :  { %443 = vmatprep.subr.mxu0 %v337_v8  ;;  %479 = vmatprep.subr.mxu1 %v337_v8 }
  0x52   :  { %444 = vmatpush3.msra.mxu0 %v321_v9  ;;  %495 = vmatpush3.msra.mxu1 %v321_v9 }
  0x53   :  { %445 = vmatprep.subr.mxu0 %v336_v10  ;;  %480 = vmatprep.subr.mxu1 %v336_v10 }
  0x54   :  { %446 = vmatpush3.msra.mxu0 %v320_v0  ;;  %496 = vmatpush3.msra.mxu1 %v320_v0 }
  0x55   :  { %447 = vmatprep.subr.mxu0 %v335_v11  ;;  %481 = vmatprep.subr.mxu1 %v335_v11 }
  0x56   :  { %448 = vmatpush3.msra.mxu0 %v319_v12  ;;  %497 = vmatpush3.msra.mxu1 %v319_v12 }
  0x57   :  { %449 = vmatprep.subr.mxu0 %v334_v13  ;;  %482 = vmatprep.subr.mxu1 %v334_v13 }
  0x58   :  { %450 = vmatpush3.msra.mxu0 %v318_v14  ;;  %498 = vmatpush3.msra.mxu1 %v318_v14 }
  0x59   :  { %451 = vmatprep.subr.mxu0 %v333_v15  ;;  %483 = vmatprep.subr.mxu1 %v333_v15 }
  0x5a   :  { %452 = vmatpush3.msra.mxu0 %v317_v16  ;;  %499 = vmatpush3.msra.mxu1 %v317_v16 }
  0x5b   :  { %453 = vmatprep.subr.mxu0 %v332_v17  ;;  %484 = vmatprep.subr.mxu1 %v332_v17 }
  0x5c   :  { %454 = vmatpush3.msra.mxu0 %v316_v18  ;;  %500 = vmatpush3.msra.mxu1 %v316_v18 }
  0x5d   :  { %455 = vmatprep.subr.mxu0 %v331_v19  ;;  %485 = vmatprep.subr.mxu1 %v331_v19 }
  0x5e   :  { %456 = vmatpush3.msra.mxu0 %v315_v20  ;;  %501 = vmatpush3.msra.mxu1 %v315_v20 }
  0x5f   :  { %457 = vmatprep.subr.mxu0 %v330_v21  ;;  %486 = vmatprep.subr.mxu1 %v330_v21 }
  0x60   :  { %458 = vmatpush3.msra.mxu0 %v314_v22  ;;  %502 = vmatpush3.msra.mxu1 %v314_v22 }
  0x61   :  { %459 = vmatprep.subr.mxu0 %v329_v23  ;;  %487 = vmatprep.subr.mxu1 %v329_v23 }
  0x62   :  { %460 = vmatpush3.msra.mxu0 %v313_v24  ;;  %503 = vmatpush3.msra.mxu1 %v313_v24 }
  0x63   :  { %461 = vmatprep.subr.mxu0 %v328_v25  ;;  %488 = vmatprep.subr.mxu1 %v328_v25 }
  0x64   :  { %462 = vmatpush3.msra.mxu0 %v312_v26  ;;  %504 = vmatpush3.msra.mxu1 %v312_v26 }
  0x65   :  { %463 = vmatprep.subr.mxu0 %v327_v27  ;;  %489 = vmatprep.subr.mxu1 %v327_v27 }
  0x66   :  { %464 = vmatpush3.msra.mxu0 %v311_v28  ;;  %505 = vmatpush3.msra.mxu1 %v311_v28 }
  0x67   :  { %465 = vmatprep.subr.mxu0 %v326_v29  ;;  %490 = vmatprep.subr.mxu1 %v326_v29 }
  0x68   :  { %466 = vmatpush3.msra.mxu0 %v310_v30  ;;  %506 = vmatpush3.msra.mxu1 %v310_v30 }
  0x69   :  { %467 = vmatprep.subr.mxu0 %v325_v31  ;;  %491 = vmatprep.subr.mxu1 %v325_v31 }
  0x6a   :  { %468 = vmatpush3.msra.mxu0 %v309_v32  ;;  %507 = vmatpush3.msra.mxu1 %v309_v32 }
  0x6b   :  { %469 = vmatprep.subr.mxu0 %v324_v33  ;;  %492 = vmatprep.subr.mxu1 %v324_v33 }
  0x6c   :  { %470 = vmatpush3.msra.mxu0 %v308_v34  ;;  %508 = vmatpush3.msra.mxu1 %v308_v34 }
 0x10a   :  { %v188_v35 = vpop.f32.mrf.mxu0  ;;  %v265_v51 = vpop.f32.mrf.mxu1 }
 0x10b   :  { %v435_v36 = vmul.f32 -1.442695, %v188_v35 }
 0x10c   :  { %v190_v37 = vpop.f32.mrf.mxu0  ;;  %v267_v53 = vpop.f32.mrf.mxu1 }
 0x10d   :  { %518 = vpow2.f32 %v435_v36  ;;  %v436_v38 = vmul.f32 -1.442695, %v190_v37 }
 0x10e   :  { %v194_v39 = vpop.f32.mrf.mxu0  ;;  %v271_v58 = vpop.f32.mrf.mxu1 }
 0x10f   :  { %520 = vpow2.f32 %v436_v38  ;;  %v437_v40 = vmul.f32 -1.442695, %v194_v39 }
 0x110   :  { %v196_v41 = vpop.f32.mrf.mxu0  ;;  %v273_v1 = vpop.f32.mrf.mxu1 }
 0x111   :  { %522 = vpow2.f32 %v437_v40  ;;  %v438_v42 = vmul.f32 -1.442695, %v196_v41 }
 0x113   :  { %524 = vpow2.f32 %v438_v42 }
 0x11a   :  { %v519_v43 = vpop.eup %518 }
 0x11b   :  { %v288_v44 = vadd.f32 1.0, %v519_v43 }
 0x11c   :  { %v521_v45 = vpop.eup %520 }
 0x11d   :  { %526 = vrcp.f32 %v288_v44  ;;  %v289_v46 = vadd.f32 1.0, %v521_v45 }
 0x11e   :  { %v523_v47 = vpop.eup %522 }
 0x11f   :  { %528 = vrcp.f32 %v289_v46  ;;  %v290_v48 = vadd.f32 1.0, %v523_v47 }
 0x120   :  { %v525_v49 = vpop.eup %524 }
 0x121   :  { %530 = vrcp.f32 %v290_v48  ;;  %v291_v50 = vadd.f32 1.0, %v525_v49 }
 0x123   :  { %532 = vrcp.f32 %v291_v50 }
 0x12a   :  { %v527_v52 = vpop.eup %526 }
 0x12b   :  { %v300_v55 = vmul.f32 %v527_v52, %v188_v35 }
 0x12c   :  { %v529_v54 = vpop.eup %528 }
 0x12d   :  { %v301_v56 = vmul.f32 %v529_v54, %v190_v37  ;;  %v304_v62 = vmul.f32 %v300_v55, %v265_v51 }
 0x12e   :  { %v531_v57 = vpop.eup %530 }
 0x12f   :  { %v305_v59 = vmul.f32 %v301_v56, %v267_v53  ;;  %v302_v61 = vmul.f32 %v531_v57, %v194_v39 }
 0x130   :  { %v533_v60 = vpop.eup %532 }
 0x131   :  { %v303_v63 = vmul.f32 %v533_v60, %v196_v41  ;;  %404 = vmatprep.mubr.f32.mxu0 %v305_v59  ;;  %v306_v3 = vmul.f32 %v302_v61, %v271_v58 }
 0x132   :  { %405 = vmatmul.mubr.f32.vlgmr.msra.gmra.mxu0 %v304_v62 }
 0x133   :  { %v307_v2 = vmul.f32 %v303_v63, %v273_v1 }
 0x135   :  { %409 = vmatprep.mubr.f32.mxu1 %v307_v2 }
 0x136   :  { %410 = vmatmul.mubr.f32.vlgmr.msra.gmra.mxu1 %v306_v3 }
 0x1f2   :  { %v471_v4 = vpop.f32.mrf.mxu0 }
 0x1f4   :  { %v472_v5 = vpop.f32.mrf.mxu0 }
 0x1f5   :  { %v473_v6 = vadd.f32 %v472_v5, %v471_v4 }
 0x1f6   :  { %v474_v7 = vpop.f32.mrf.mxu1 }
 0x1f7   :  { %415 = vst [vmem:[#allocation8] sm:$0xff] %v473_v6 }
 0x1f8   :  { %v475_v8 = vpop.f32.mrf.mxu1 }
 0x1f9   :  { %v476_v9 = vadd.f32 %v475_v8, %v474_v7 }
 0x1fb   :  { %416 = vst [vmem:[#allocation8 + $0x8] sm:$0xff] %v476_v9 }
 0x1fc   :  { %605 = shalt.err (!%p602_p5)
}
 0x1fd   :  { %428 = dma.vmem_to_hbm [thread:$0]  %s423_s2, 256, %s677_s3, [#allocation4], %s624_s22, %s624_s22, %s625_s23  }
 0x1fe   :  { %618 = dma.done.wait [#allocation4], 256  }
 0x1ff   :  { %619 = vsyncadd [#allocation4], 4294967040 }
 0x200   :  { %432 = vsyncpa [#allocation3], 1 }
 0x201   :  { %433 = vsyncpa [#allocation6], 1 }
 0x202   :  { %434 = vsyncpa [#allocation4], 1 }

</bundles_post_ra>
